<compile_context>
chip_gen: v7x
topology: tpu7x:2x2x1
jax: 0.10.0
libtpu: 0.0.40
codegen_flags: <defaults>
</compile_context>

<pallas_src>
import functools

import jax
import jax.numpy as jnp
from jax import lax
from jax.experimental import pallas as pl
from jax.experimental.pallas import tpu as pltpu


def _nlinear_kernel(trend_ref, seasonal_ref, w_ref, b_ref, o_ref,
                    *, seq_len, pred_len):
    # trend_ref    : (Bt, S, C)
    # seasonal_ref : (Bt, S, C)
    # w_ref        : (P, S)   Linear weight (maps seq -> pred along time axis)
    # b_ref        : (1, P, 1)
    # o_ref        : (Bt, P, C)
    trend = trend_ref[...]
    bt = trend.shape[0]

    if seq_len >= pred_len:
        # Diffusion_trend stubbed to zeros => x_trend == orgin_trend.
        x = trend
    else:
        x = trend + seasonal_ref[...]

    # NLinear normalization: subtract the last time step (broadcast over time).
    seq_last = x[:, seq_len - 1:seq_len, :]            # (Bt, 1, C)
    xc = x - seq_last

    # out[b, p, c] = sum_s W[p, s] * xc[b, s, c]  -- single batched MXU dot.
    w = jnp.broadcast_to(w_ref[...][None, :, :], (bt, pred_len, seq_len))
    out = lax.dot_general(
        w, xc,
        dimension_numbers=(((2,), (1,)), ((0,), (0,))),
        preferred_element_type=jnp.float32)            # (Bt, P, C)

    out = out + b_ref[...]                             # (1, P, 1) broadcast
    out = out + seq_last                               # add last value back
    if seq_len >= pred_len:
        out = out + seasonal_ref[:, pl.ds(seq_len - pred_len, pred_len), :]

    o_ref[...] = out.astype(o_ref.dtype)


def _pick_batch_tile(b, bytes_per_batch, budget_bytes):
    """Largest divisor of b whose per-step footprint fits the VMEM budget.

    When the total footprint is big enough to matter, also cap at ceil(b/2)
    so the 'parallel' grid has >= 2 steps and both v7x TensorCores get work.
    """
    cap = max(1, budget_bytes // max(bytes_per_batch, 1))
    total_bytes = b * bytes_per_batch
    if b >= 2 and (total_bytes > budget_bytes or total_bytes > (2 << 20)):
        cap = min(cap, (b + 1) // 2)
    bt = 1
    for d in range(1, b + 1):
        if b % d == 0 and d <= cap:
            bt = d
    return bt


def nlinear_forward(x, stl_data, weight, bias, *, seq_len, pred_len):
    """Mirrors Model.forward (individual=False, rev=None, diffusion stubbed)."""
    seasonal, trend, resid = stl_data
    B, S, C = x.shape
    assert S == seq_len
    del resid  # unused by the reference forward

    P = pred_len
    seasonal = seasonal.reshape(B, S, C)
    trend = trend.reshape(B, S, C)
    bias3d = bias.reshape(1, P, 1)

    itemsize = jnp.dtype(x.dtype).itemsize
    # Per-batch rows live per step: trend (S) + seasonal (S) + output (P),
    # doubled for the pipeline's double buffering.
    bytes_per_batch = (2 * S + P) * C * itemsize * 2
    vmem_limit = 32 * 1024 * 1024
    Bt = _pick_batch_tile(B, bytes_per_batch, budget_bytes=vmem_limit // 4)
    grid = (B // Bt,)

    kernel = functools.partial(_nlinear_kernel, seq_len=seq_len, pred_len=pred_len)

    flops = 2 * B * P * S * C
    bytes_accessed = (2 * S + P) * B * C * itemsize + (P * S + P) * itemsize

    out = pl.pallas_call(
        kernel,
        out_shape=jax.ShapeDtypeStruct((B, P, C), x.dtype),
        grid_spec=pltpu.PrefetchScalarGridSpec(
            num_scalar_prefetch=0,
            grid=grid,
            in_specs=[
                pl.BlockSpec((Bt, S, C), lambda b: (b, 0, 0)),   # trend
                pl.BlockSpec((Bt, S, C), lambda b: (b, 0, 0)),   # seasonal
                pl.BlockSpec((P, S), lambda b: (0, 0)),          # weight
                pl.BlockSpec((1, P, 1), lambda b: (0, 0, 0)),    # bias
            ],
            out_specs=pl.BlockSpec((Bt, P, C), lambda b: (b, 0, 0)),
        ),
        compiler_params=pltpu.CompilerParams(
            dimension_semantics=("parallel",),
            vmem_limit_bytes=vmem_limit),
        cost_estimate=pl.CostEstimate(
            flops=flops, transcendentals=0, bytes_accessed=bytes_accessed),
    )(trend, seasonal, weight, bias3d)

    return out  # already (B, P, C); no output transpose needed


def reference_forward(x, stl_data, weight, bias, *, seq_len, pred_len):
    """Pure-JAX reference of the same (diffusion-stubbed) forward."""
    seasonal, trend, _ = stl_data
    B, S, C = x.shape
    seasonal = seasonal.reshape(B, S, C)
    trend = trend.reshape(B, S, C)
    if seq_len >= pred_len:
        xx = trend
    else:
        xx = trend + seasonal
    seq_last = xx[:, -1:, :]
    xc = xx - seq_last
    out = jnp.einsum('bsc,ps->bpc', xc, weight) + bias[None, :, None]
    out = out + seq_last
    if seq_len >= pred_len:
        out = out + seasonal[:, -pred_len:, :]
    return out


def _make_case(key, B, seq_len, pred_len, C):
    k_x, k_s, k_t, k_r, k_w, k_b = jax.random.split(key, 6)
    x = jax.random.normal(k_x, (B, seq_len, C), dtype=jnp.float32)
    seasonal = jax.random.normal(k_s, (B, seq_len, C), dtype=jnp.float32)
    trend = jax.random.normal(k_t, (B, seq_len, C), dtype=jnp.float32)
    resid = jax.random.normal(k_r, (B, seq_len, C), dtype=jnp.float32)
    bound = 1.0 / (seq_len ** 0.5)
    weight = jax.random.uniform(k_w, (pred_len, seq_len), jnp.float32, -bound, bound)
    bias = jax.random.uniform(k_b, (pred_len,), jnp.float32, -bound, bound)
    return x, (seasonal, trend, resid), weight, bias


def _check(key, B, seq_len, pred_len, C):
    x, stl_data, weight, bias = _make_case(key, B, seq_len, pred_len, C)
    out = nlinear_forward(x, stl_data, weight, bias,
                          seq_len=seq_len, pred_len=pred_len)
    out = jax.block_until_ready(out)
    ref = reference_forward(x, stl_data, weight, bias,
                            seq_len=seq_len, pred_len=pred_len)
    assert out.shape == (B, pred_len, C)
    assert jnp.allclose(out, ref, atol=1e-5, rtol=1e-5)


if __name__ == "__main__":
    key = jax.random.PRNGKey(0)
    k0, k1, k2 = jax.random.split(key, 3)

    # configs: seq_len=16, pred_len=8, enc_in=4, individual=False, rev=None
    _check(k0, B=2, seq_len=16, pred_len=8, C=4)

    # seq_len < pred_len branch
    _check(k1, B=2, seq_len=8, pred_len=16, C=4)

    # larger channel count / batch (exercises the batch-tiled path)
    _check(k2, B=4, seq_len=16, pred_len=8, C=96)

    print("KERNEL_OK")
</pallas_src>

<mosaic_0001>
module attributes {stable_mosaic.version = 11 : i64} {
  func.func @_nlinear_kernel(%arg0: i32, %arg1: memref<2x16x4xf32, #tpu.memory_space<vmem>>, %arg2: memref<2x16x4xf32, #tpu.memory_space<vmem>>, %arg3: memref<8x16xf32, #tpu.memory_space<vmem>>, %arg4: memref<1x8x1xf32, #tpu.memory_space<vmem>>, %arg5: memref<2x8x4xf32, #tpu.memory_space<vmem>>) attributes {dimension_semantics = [#tpu.dimension_semantics<parallel>], iteration_bounds = array<i64: 1>, scalar_prefetch = 0 : i64, scratch_operands = 0 : i64, tpu.core_type = #tpu.core_type<tc>, window_params = [{transform_indices = @transform_0, window_bounds = array<i64: 2, 16, 4>}, {transform_indices = @transform_1, window_bounds = array<i64: 2, 16, 4>}, {pipeline_mode = #tpu.pipeline_mode<synchronous>, transform_indices = @transform_2, window_bounds = array<i64: 8, 16>}, {pipeline_mode = #tpu.pipeline_mode<synchronous>, transform_indices = @transform_3, window_bounds = array<i64: 1, 8, 1>}, {transform_indices = @transform_4, window_bounds = array<i64: 2, 8, 4>}]} {
    %c0 = arith.constant 0 : index
    %c0_0 = arith.constant 0 : index
    %c0_1 = arith.constant 0 : index
    %0 = vector.load %arg1[%c0, %c0_0, %c0_1] : memref<2x16x4xf32, #tpu.memory_space<vmem>>, vector<2x16x4xf32>
    %1 = vector.extract_strided_slice %0 {offsets = [0, 15, 0], sizes = [2, 1, 4], strides = [1, 1, 1]} : vector<2x16x4xf32> to vector<2x1x4xf32>
    %2 = vector.broadcast %1 : vector<2x1x4xf32> to vector<2x16x4xf32>
    %3 = arith.subf %0, %2 : vector<2x16x4xf32>
    %c0_2 = arith.constant 0 : index
    %c0_3 = arith.constant 0 : index
    %4 = vector.load %arg3[%c0_2, %c0_3] : memref<8x16xf32, #tpu.memory_space<vmem>>, vector<8x16xf32>
    %5 = vector.shape_cast %4 : vector<8x16xf32> to vector<1x8x16xf32>
    %6 = vector.shape_cast %5 : vector<1x8x16xf32> to vector<1x8x16xf32>
    %7 = vector.broadcast %6 : vector<1x8x16xf32> to vector<2x8x16xf32>
    %cst = arith.constant dense<0.000000e+00> : vector<2x8x4xf32>
    %8 = tpu.matmul %7, %3, %cst {dimension_numbers = #tpu.dot_dimension_numbers<[2], [1], [1], [2], [0, 0, 0, 1, 1, 2], [0], [0]>} : vector<2x8x16xf32>, vector<2x16x4xf32>, vector<2x8x4xf32> -> vector<2x8x4xf32>
    %c0_4 = arith.constant 0 : index
    %c0_5 = arith.constant 0 : index
    %c0_6 = arith.constant 0 : index
    %9 = vector.load %arg4[%c0_4, %c0_5, %c0_6] : memref<1x8x1xf32, #tpu.memory_space<vmem>>, vector<1x8x1xf32>
    %10 = vector.broadcast %9 : vector<1x8x1xf32> to vector<2x8x4xf32>
    %11 = arith.addf %8, %10 : vector<2x8x4xf32>
    %12 = vector.broadcast %1 : vector<2x1x4xf32> to vector<2x8x4xf32>
    %13 = arith.addf %11, %12 : vector<2x8x4xf32>
    %c0_7 = arith.constant 0 : index
    %c8 = arith.constant 8 : index
    %c0_8 = arith.constant 0 : index
    %14 = vector.load %arg2[%c0_7, %c8, %c0_8] : memref<2x16x4xf32, #tpu.memory_space<vmem>>, vector<2x8x4xf32>
    %15 = arith.addf %13, %14 : vector<2x8x4xf32>
    %c0_9 = arith.constant 0 : index
    %c0_10 = arith.constant 0 : index
    %c0_11 = arith.constant 0 : index
    %16 = vector.load %arg5[%c0_9, %c0_10, %c0_11] : memref<2x8x4xf32, #tpu.memory_space<vmem>>, vector<2x8x4xf32>
    tpu.vector_store %arg5[%c0_9, %c0_10, %c0_11], %15 {strides = array<i32>} : memref<2x8x4xf32, #tpu.memory_space<vmem>>, vector<2x8x4xf32>,
    return
  }
  func.func @transform_0(%arg0: i32) -> (i32, i32, i32) {
    %c0_i32 = arith.constant 0 : i32
    %c0_i32_0 = arith.constant 0 : i32
    %c0_i32_1 = arith.constant 0 : i32
    return %arg0, %c0_i32, %c0_i32_0 : i32, i32, i32
  }
  func.func @transform_1(%arg0: i32) -> (i32, i32, i32) {
    %c0_i32 = arith.constant 0 : i32
    %c0_i32_0 = arith.constant 0 : i32
    %c0_i32_1 = arith.constant 0 : i32
    return %arg0, %c0_i32, %c0_i32_0 : i32, i32, i32
  }
  func.func @transform_2(%arg0: i32) -> (i32, i32) {
    %c0_i32 = arith.constant 0 : i32
    %c0_i32_0 = arith.constant 0 : i32
    %c0_i32_1 = arith.constant 0 : i32
    return %c0_i32, %c0_i32_0 : i32, i32
  }
  func.func @transform_3(%arg0: i32) -> (i32, i32, i32) {
    %c0_i32 = arith.constant 0 : i32
    %c0_i32_0 = arith.constant 0 : i32
    %c0_i32_1 = arith.constant 0 : i32
    %c0_i32_2 = arith.constant 0 : i32
    return %c0_i32, %c0_i32_0, %c0_i32_1 : i32, i32, i32
  }
  func.func @transform_4(%arg0: i32) -> (i32, i32, i32) {
    %c0_i32 = arith.constant 0 : i32
    %c0_i32_0 = arith.constant 0 : i32
    %c0_i32_1 = arith.constant 0 : i32
    return %arg0, %c0_i32, %c0_i32_0 : i32, i32, i32
  }
}

</mosaic_0001>

<bundles_post_ra>
// kernel: tpu_custom_call.1
= control target key start
LH: loop header
LB: loop body
LE: loop exit
PB: predicated region body
PF: predicated region fallthrough
CT: control target
= control target key end

     0   :  { %v21_v0 = vlaneseq  ;;  %v230_v1 = vmov 0.0|0.0   ;;  %vm231_vm0 = vmmov 0   ;;  %v232_v3 = vmov 0.0   ;;  %s289_s0 = inlined_call_operand.vmem [shape: f32[2,16,4], index: 0, kind: input, shape index: {}]   ;;  %s290_s3 = inlined_call_operand.vmem [shape: f32[1,8,1], index: 3, kind: input, shape index: {}]   ;;  %s291_s2 = inlined_call_operand.vmem [shape: f32[8,16], index: 2, kind: input, shape index: {}]   ;;  %s292_s1 = inlined_call_operand.vmem [shape: f32[2,16,4], index: 1, kind: input, shape index: {}]   ;;  %s293_s4 = inlined_call_operand.vmem [shape: f32[2,8,4], index: 4, kind: output, shape index: {}]  }
   0x1   :  { %219 = vmatprep.subr.bf16.mxu0 %v230_v1  ;;  %222 = vmatprep.subr.bf16.mxu1 %v230_v1  ;;  %v34_v4 = vld [vmem:[%s290_s3] sm:$0xff]  ;;  %v18_v5 = vld [vmem:[%s289_s0 + $0x8] sm:$0xff]  ;;  %v20_v6 = vld [vmem:[%s289_s0 + $0x18] sm:$0xff]  ;;  %v233_v7 = vmov 0   ;;  %vm40_vm1 = vcmask 130048   ;;  %vm190_vm2 = vcmask 31744  }
   0x2   :  { %v22_v2 = vshrl.u32 %v21_v0, 7  ;;  %209 = vmatprep.mubr.msk.f32.mxu0 %vm231_vm0, %v232_v3  ;;  %216 = vmatprep.mubr.msk.f32.mxu1 %vm231_vm0, %v232_v3  ;;  %v17_v9 = vld [vmem:[%s289_s0] sm:$0xff]  ;;  %v19_v10 = vld [vmem:[%s289_s0 + $0x10] sm:$0xff]  ;;  %v186_v27 = vld [vmem:[%s292_s1 + $0x8] sm:$0xff] }
   0x3   :  { %229 = vset.pattern.permute.xlu0 %v233_v7  ;;  %v33_v19 = vld [vmem:[%s291_s2] sm:$0xff]  ;;  %v187_v28 = vld [vmem:[%s292_s1 + $0x18] sm:$0xff] }
   0x4   :  { %v23_v8 = vsub.s32 7, %v22_v2  ;;  %37 = vperm.xlu0 %229, %v34_v4  }
   0x6   :  { %v24_v11 = vrot.slane %v18_v5, %v23_v8  ;;  %v28_v12 = vrot.slane %v20_v6, %v23_v8 }
   0x8   :  { %v29_v13 = vsub.f32 %v17_v9, %v24_v11  ;;  %v30_v14 = vsub.f32 %v18_v5, %v24_v11  ;;  %v31_v15 = vsub.f32 %v19_v10, %v28_v12  ;;  %v32_v16 = vsub.f32 %v20_v6, %v28_v12 }
   0xa   :  { %v220_v17 = vpack.c.bf16 %v30_v14, %v29_v13  ;;  %v223_v18 = vpack.c.bf16 %v32_v16, %v31_v15 }
   0xc   :  { %221 = vmatpush3.bf16.msra.mxu0 %v220_v17  ;;  %224 = vmatpush3.bf16.msra.mxu1 %v223_v18 }
   0xf   :  { %210 = vmatmul.mubr.msk.f32.vlgmr.msra.gmra.mrb[0].mxu0 %vm40_vm1, %v33_v19  ;;  %217 = vmatmul.mubr.msk.f32.vlgmr.msra.gmra.mrb[0].mxu1 %vm40_vm1, %v33_v19 }
  0x83   :  { %v38_v20 = vpop.permute.xlu0 %37 }
  0xe2   :  { %v110_v21 = vpop.f32.mrb[0].mxu0  ;;  %v180_v22 = vpop.f32.mrb[0].mxu1 }
  0xe3   :  { %v111_v23 = vadd.f32 %v110_v21, %v38_v20  ;;  %v181_v24 = vadd.f32 %v180_v22, %v38_v20  ;;  %v211_v25 = vpop.f32.mrb[1].mxu0  ;;  %v218_v26 = vpop.f32.mrb[1].mxu1 }
  0xe5   :  { %v184_v29 = vadd.f32 %v111_v23, %v24_v11  ;;  %v185_v30 = vadd.f32 %v181_v24, %v28_v12 }
  0xe7   :  { %v188_v31 = vadd.f32 %v186_v27, %v184_v29  ;;  %v189_v32 = vadd.f32 %v187_v28, %v185_v30 }
  0xe9   :  { %191 = vst.msk [vmem:[%s293_s4] sm:$0xff] %vm190_vm2, %v188_v31  ;;  %192 = vst.msk [vmem:[%s293_s4 + $0x8] sm:$0xff] %vm190_vm2, %v189_v32 }

</bundles_post_ra>
